<compile_context>
chip_gen: v6e
topology: v6e:2x2x1
jax: 0.10.0
libtpu: 0.0.40
codegen_flags: <defaults>
</compile_context>

<pallas_src>
import jax
import jax.numpy as jnp
from jax import lax
from jax.experimental import pallas as pl
from jax.experimental.pallas import tpu as pltpu

_LANES = 128
_MAX_TILE_ROWS = 2048        # rows of 128 lanes per grid step (f32: 1 MiB/buffer)
_EPS = 1e-12                 # torch.nn.CosineEmbeddingLoss additive epsilon (ATen)


def _round_up(x, m):
    return ((x + m - 1) // m) * m


def _sublane_align(*dtypes):
    # Full packed vregs: 8 sublanes for 4-byte, 16 for 2-byte, 32 for 1-byte.
    return max(max(8, 32 // jnp.dtype(d).itemsize) for d in dtypes)


def _lane_shift(x, s):
    # Shift values `s` lanes towards higher lane index (result[i] = x[i - s]).
    # jnp.roll keeps the kernel portable (interpret mode friendly); wrapped
    # lanes only land on non group-last positions and are masked downstream.
    return jnp.roll(x, s, axis=1)


def _make_dir_cos_sum_kernel(num_coords, tile_rows, total_elems, inner_tiles,
                             has_weight):
    """Lane-dense kernel accumulating sum((1 - cos) * w) over the grid."""

    def body(p_ref, t_ref, w_ref, out_ref):
        part_idx = pl.program_id(0)   # 'parallel' partition (v7x: one per TC)
        step = pl.program_id(1)       # 'arbitrary' row-tile sweep

        p = p_ref[...].astype(jnp.float32)
        t = t_ref[...].astype(jnp.float32)
        prod = p * t
        pn2 = p * p
        tn2 = t * t

        # Reduce the num_coords adjacent lanes of each direction vector onto
        # the group-last lane (lane % C == C-1) with C-1 static lane shifts.
        dsum, psum, tsum = prod, pn2, tn2
        for s in range(1, num_coords):
            dsum = dsum + _lane_shift(prod, s)
            psum = psum + _lane_shift(pn2, s)
            tsum = tsum + _lane_shift(tn2, s)

        # cos = dot * rsqrt((||p||^2+eps)*(||t||^2+eps)) -> one EUP rsqrt.
        cos = dsum * lax.rsqrt((psum + _EPS) * (tsum + _EPS))
        loss = 1.0 - cos
        if has_weight:
            # Per-element-expanded weight: group-last lane carries w_row.
            loss = loss * w_ref[...].astype(jnp.float32)

        # Keep only group-last lanes of valid rows (also zeroes the tail
        # padding, which all lives in the last row tile).
        lane = lax.broadcasted_iota(jnp.int32, (tile_rows, _LANES), 1)
        row = lax.broadcasted_iota(jnp.int32, (tile_rows, _LANES), 0)
        tile_idx = part_idx * inner_tiles + step
        flat_idx = (tile_idx * tile_rows + row) * _LANES + lane
        keep = (lane % num_coords == num_coords - 1) & (flat_idx < total_elems)
        contrib = jnp.where(keep, loss, 0.0)

        # (8,128) vreg-shaped partial sums (pure VPU adds, no per-step
        # cross-lane reduce), accumulated into the VMEM-resident output block.
        part = contrib.reshape(tile_rows // 8, 8, _LANES).sum(axis=0)

        @pl.when(step == 0)
        def _():
            out_ref[0] = part

        @pl.when(step > 0)
        def _():
            out_ref[0] += part

    if has_weight:
        def kernel(p_ref, t_ref, w_ref, out_ref):
            body(p_ref, t_ref, w_ref, out_ref)
    else:
        def kernel(p_ref, t_ref, out_ref):
            body(p_ref, t_ref, None, out_ref)
    return kernel


def _dir_cos_weighted_sum(pred, target, weight, max_tile_rows=_MAX_TILE_ROWS):
    """sum over all rows of (1 - cos(pred_row, target_row)) * weight_row."""
    num_samples, num_dir, num_coords = pred.shape
    M = num_samples * num_dir
    C = num_coords
    total = M * C

    if _LANES % C != 0:
        # TODO(synk): lane-group reduction needs num_coords to divide 128;
        # fall back to plain JAX for exotic coordinate counts.
        p = pred.reshape(M, C).astype(jnp.float32)
        t = target.reshape(M, C).astype(jnp.float32)
        dot = jnp.sum(p * t, axis=-1)
        pn2 = jnp.sum(p * p, axis=-1) + _EPS
        tn2 = jnp.sum(t * t, axis=-1) + _EPS
        loss = 1.0 - dot * lax.rsqrt(pn2 * tn2)
        if weight is not None:
            loss = loss * weight.reshape(M).astype(jnp.float32)
        return jnp.sum(loss)

    align = _sublane_align(pred.dtype, target.dtype)
    rows = pl.cdiv(total, _LANES)                 # 128-lane rows actually used
    raw_tiles = pl.cdiv(rows, max_tile_rows)
    num_parts = 2 if raw_tiles >= 2 else 1        # 'parallel' split (2 TCs on v7x)
    num_tiles = _round_up(raw_tiles, num_parts)
    tile_rows = _round_up(pl.cdiv(rows, num_tiles), align)
    rpad = num_tiles * tile_rows                  # padding bounded by alignment
    inner_tiles = num_tiles // num_parts

    def pack(x_flat):
        # flatten is free; only the (small) tail pad copies.
        return jnp.pad(x_flat, (0, rpad * _LANES - total)).reshape(rpad, _LANES)

    operands = [pack(pred.reshape(total)), pack(target.reshape(total))]

    def row_map(p, i):
        return (p * inner_tiles + i, 0)

    data_spec = pl.BlockSpec((tile_rows, _LANES), row_map)
    in_specs = [data_spec, data_spec]

    has_weight = weight is not None
    if has_weight:
        w = jnp.broadcast_to(weight.reshape(M, 1).astype(jnp.float32), (M, C))
        operands.append(pack(w.reshape(total)))
        in_specs.append(pl.BlockSpec((tile_rows, _LANES), row_map))

    kernel = _make_dir_cos_sum_kernel(C, tile_rows, total, inner_tiles,
                                      has_weight)
    partial = pl.pallas_call(
        kernel,
        out_shape=jax.ShapeDtypeStruct((num_parts, 8, _LANES), jnp.float32),
        grid_spec=pltpu.PrefetchScalarGridSpec(
            num_scalar_prefetch=0,
            grid=(num_parts, inner_tiles),
            in_specs=in_specs,
            out_specs=pl.BlockSpec((1, 8, _LANES), lambda p, i: (p, 0, 0)),
        ),
        compiler_params=pltpu.CompilerParams(
            dimension_semantics=("parallel", "arbitrary"),
            vmem_limit_bytes=32 * 1024 * 1024,
        ),
    )(*operands)
    # Single cross-lane reduce + per-partition sum, done once outside the loop.
    return jnp.sum(partial)


def pts_dir_cos_loss(pred, target, weight=None, reduction='mean',
                     avg_factor=None, loss_weight=1.0):
    """JAX/Pallas equivalent of the reference pts_dir_cos_loss + reduction."""
    if avg_factor is None:
        raise ValueError('avg_factor should not be none for PtsDirCosLoss')
    if target.size == 0:
        return loss_weight * (jnp.sum(pred) * 0.0)

    if reduction == 'mean':
        total = _dir_cos_weighted_sum(pred, target, weight)
        return (loss_weight / jnp.asarray(avg_factor, jnp.float32)) * total

    if reduction == 'none':
        # TODO(synk): 'none' reduction kept as a tiny plain-JAX epilogue
        # (per-row output, not worth a dedicated kernel launch).
        p = pred.astype(jnp.float32)
        t = target.astype(jnp.float32)
        dot = jnp.sum(p * t, axis=-1)
        pn2 = jnp.sum(p * p, axis=-1) + _EPS
        tn2 = jnp.sum(t * t, axis=-1) + _EPS
        loss = 1.0 - dot * lax.rsqrt(pn2 * tn2)
        if weight is not None:
            loss = loss * weight.reshape(loss.shape).astype(jnp.float32)
        return loss_weight * loss

    # mirrors the reference: avg_factor can not be used with reduction="sum"
    raise ValueError('avg_factor can not be used with reduction="sum"')


class PtsDirCosLoss:
    """Stateless module mirroring the PyTorch class (no learnable params)."""

    def __init__(self, reduction='mean', loss_weight=1.0):
        self.reduction = reduction
        self.loss_weight = loss_weight

    def __call__(self, pred, target, weight=None, avg_factor=None,
                 reduction_override=None):
        assert reduction_override in (None, 'none', 'mean', 'sum')
        reduction = reduction_override if reduction_override else self.reduction
        return pts_dir_cos_loss(pred, target, weight=weight,
                                reduction=reduction,
                                avg_factor=avg_factor,
                                loss_weight=self.loss_weight)


if __name__ == "__main__":
    key = jax.random.PRNGKey(0)
    k_pred, k_tgt, k_w, k2 = jax.random.split(key, 4)

    def ref_loss(p, t, w, avg):
        # plain-JAX reference (torch CosineEmbeddingLoss, target=+1, eps=1e-12)
        dot = jnp.sum(p * t, axis=-1)
        pn2 = jnp.sum(p * p, axis=-1) + _EPS
        tn2 = jnp.sum(t * t, axis=-1) + _EPS
        cos = dot / jnp.sqrt(pn2 * tn2)
        loss = 1.0 - cos
        if w is not None:
            loss = loss * w
        return jnp.sum(loss) / avg

    # ---- small MapTR-like case: 2-D direction vectors --------------------
    num_samples, num_dir, num_coords = 6, 8, 2
    pred = jax.random.normal(k_pred, (num_samples, num_dir, num_coords), jnp.float32)
    target = jax.random.normal(k_tgt, (num_samples, num_dir, num_coords), jnp.float32)
    weight = jax.random.uniform(k_w, (num_samples, num_dir), jnp.float32)
    avg_factor = float(num_samples * num_dir)

    module = PtsDirCosLoss(reduction='mean', loss_weight=1.0)
    loss_w = jax.block_until_ready(module(pred, target, weight=weight,
                                          avg_factor=avg_factor))
    loss_nw = jax.block_until_ready(module(pred, target, weight=None,
                                           avg_factor=avg_factor))
    ref_w = ref_loss(pred, target, weight, avg_factor)
    ref_nw = ref_loss(pred, target, None, avg_factor)
    assert jnp.allclose(loss_w, ref_w, rtol=1e-5, atol=1e-6), (loss_w, ref_w)
    assert jnp.allclose(loss_nw, ref_nw, rtol=1e-5, atol=1e-6), (loss_nw, ref_nw)

    # ---- exercise the multi-tile grid + 'parallel' partition + masking ----
    ns2, nd2 = 40, 20
    pred2 = jax.random.normal(k2, (ns2, nd2, num_coords), jnp.float32)
    target2 = jax.random.normal(jax.random.fold_in(k2, 1),
                                (ns2, nd2, num_coords), jnp.float32)
    weight2 = jax.random.uniform(jax.random.fold_in(k2, 2), (ns2, nd2), jnp.float32)
    got = jax.block_until_ready(
        _dir_cos_weighted_sum(pred2, target2, weight2, max_tile_rows=8))
    want = ref_loss(pred2, target2, weight2, 1.0)
    assert jnp.allclose(got, want, rtol=1e-5, atol=1e-4), (got, want)

    print("KERNEL_OK")
</pallas_src>

<mosaic_0001>
module attributes {stable_mosaic.version = 11 : i64} {
  func.func @kernel(%arg0: i32, %arg1: i32, %arg2: memref<8x128xf32, #tpu.memory_space<vmem>>, %arg3: memref<8x128xf32, #tpu.memory_space<vmem>>, %arg4: memref<8x128xf32, #tpu.memory_space<vmem>>, %arg5: memref<1x8x128xf32, #tpu.memory_space<vmem>>) attributes {dimension_semantics = [#tpu.dimension_semantics<parallel>, #tpu.dimension_semantics<arbitrary>], iteration_bounds = array<i64: 1, 1>, scalar_prefetch = 0 : i64, scratch_operands = 0 : i64, tpu.core_type = #tpu.core_type<tc>, window_params = [{transform_indices = @transform_0, window_bounds = array<i64: 8, 128>}, {transform_indices = @transform_1, window_bounds = array<i64: 8, 128>}, {transform_indices = @transform_2, window_bounds = array<i64: 8, 128>}, {transform_indices = @transform_3, window_bounds = array<i64: 1, 8, 128>}]} {
    %c0 = arith.constant 0 : index
    %c0_0 = arith.constant 0 : index
    %0 = vector.load %arg2[%c0, %c0_0] : memref<8x128xf32, #tpu.memory_space<vmem>>, vector<8x128xf32>
    %c0_1 = arith.constant 0 : index
    %c0_2 = arith.constant 0 : index
    %1 = vector.load %arg3[%c0_1, %c0_2] : memref<8x128xf32, #tpu.memory_space<vmem>>, vector<8x128xf32>
    %2 = arith.mulf %0, %1 : vector<8x128xf32>
    %3 = arith.mulf %0, %0 : vector<8x128xf32>
    %4 = arith.mulf %1, %1 : vector<8x128xf32>
    %5 = vector.extract_strided_slice %2 {offsets = [0, 127], sizes = [8, 1], strides = [1, 1]} : vector<8x128xf32> to vector<8x1xf32>
    %6 = vector.extract_strided_slice %2 {offsets = [0, 0], sizes = [8, 127], strides = [1, 1]} : vector<8x128xf32> to vector<8x127xf32>
    %7 = tpu.concatenate %5, %6 in 1 : vector<8x1xf32>, vector<8x127xf32> -> vector<8x128xf32>
    %8 = arith.addf %2, %7 : vector<8x128xf32>
    %9 = vector.extract_strided_slice %3 {offsets = [0, 127], sizes = [8, 1], strides = [1, 1]} : vector<8x128xf32> to vector<8x1xf32>
    %10 = vector.extract_strided_slice %3 {offsets = [0, 0], sizes = [8, 127], strides = [1, 1]} : vector<8x128xf32> to vector<8x127xf32>
    %11 = tpu.concatenate %9, %10 in 1 : vector<8x1xf32>, vector<8x127xf32> -> vector<8x128xf32>
    %12 = arith.addf %3, %11 : vector<8x128xf32>
    %13 = vector.extract_strided_slice %4 {offsets = [0, 127], sizes = [8, 1], strides = [1, 1]} : vector<8x128xf32> to vector<8x1xf32>
    %14 = vector.extract_strided_slice %4 {offsets = [0, 0], sizes = [8, 127], strides = [1, 1]} : vector<8x128xf32> to vector<8x127xf32>
    %15 = tpu.concatenate %13, %14 in 1 : vector<8x1xf32>, vector<8x127xf32> -> vector<8x128xf32>
    %16 = arith.addf %4, %15 : vector<8x128xf32>
    %cst = arith.constant 9.99999996E-13 : f32
    %17 = vector.broadcast %cst : f32 to vector<8x128xf32>
    %18 = arith.addf %12, %17 : vector<8x128xf32>
    %cst_3 = arith.constant 9.99999996E-13 : f32
    %19 = vector.broadcast %cst_3 : f32 to vector<8x128xf32>
    %20 = arith.addf %16, %19 : vector<8x128xf32>
    %21 = arith.mulf %18, %20 : vector<8x128xf32>
    %22 = math.rsqrt %21 : vector<8x128xf32>
    %23 = arith.mulf %8, %22 : vector<8x128xf32>
    %cst_4 = arith.constant 1.000000e+00 : f32
    %24 = vector.broadcast %cst_4 : f32 to vector<8x128xf32>
    %25 = arith.subf %24, %23 : vector<8x128xf32>
    %c0_5 = arith.constant 0 : index
    %c0_6 = arith.constant 0 : index
    %26 = vector.load %arg4[%c0_5, %c0_6] : memref<8x128xf32, #tpu.memory_space<vmem>>, vector<8x128xf32>
    %27 = arith.mulf %25, %26 : vector<8x128xf32>
    %28 = tpu.iota {dimensions = array<i32: 1>} : vector<8x128xi32>
    %29 = tpu.iota {dimensions = array<i32: 0>} : vector<8x128xi32>
    %c1_i32 = arith.constant 1 : i32
    %30 = arith.muli %arg0, %c1_i32 : i32
    %31 = arith.addi %30, %arg1 : i32
    %c8_i32 = arith.constant 8 : i32
    %32 = arith.muli %31, %c8_i32 : i32
    %33 = vector.broadcast %32 : i32 to vector<8x128xi32>
    %34 = arith.addi %33, %29 : vector<8x128xi32>
    %c128_i32 = arith.constant 128 : i32
    %35 = vector.broadcast %c128_i32 : i32 to vector<8x128xi32>
    %36 = arith.muli %34, %35 : vector<8x128xi32>
    %37 = arith.addi %36, %28 : vector<8x128xi32>
    %c2_i32 = arith.constant 2 : i32
    %c0_i32 = arith.constant 0 : i32
    %38 = arith.cmpi eq, %c2_i32, %c0_i32 : i32
    %c1_i32_7 = arith.constant 1 : i32
    %39 = arith.select %38, %c1_i32_7, %c2_i32 : i32
    %40 = vector.broadcast %39 : i32 to vector<8x128xi32>
    %41 = arith.remsi %28, %40 : vector<8x128xi32>
    %c0_i32_8 = arith.constant 0 : i32
    %42 = vector.broadcast %c0_i32_8 : i32 to vector<8x128xi32>
    %43 = arith.cmpi ne, %41, %42 : vector<8x128xi32>
    %c0_i32_9 = arith.constant 0 : i32
    %44 = vector.broadcast %c0_i32_9 : i32 to vector<8x128xi32>
    %45 = arith.cmpi slt, %41, %44 : vector<8x128xi32>
    %c0_i32_10 = arith.constant 0 : i32
    %46 = arith.cmpi slt, %39, %c0_i32_10 : i32
    %47 = vector.broadcast %46 : i1 to vector<8x128xi1>
    %48 = vector.broadcast %47 : vector<8x128xi1> to vector<8x128xi1>
    %49 = arith.xori %45, %48 : vector<8x128xi1>
    %50 = arith.andi %49, %43 : vector<8x128xi1>
    %51 = vector.broadcast %39 : i32 to vector<8x128xi32>
    %52 = arith.addi %41, %51 : vector<8x128xi32>
    %53 = arith.select %50, %52, %41 : vector<8x128xi1>, vector<8x128xi32>
    %c1_i32_11 = arith.constant 1 : i32
    %54 = vector.broadcast %c1_i32_11 : i32 to vector<8x128xi32>
    %55 = arith.cmpi eq, %53, %54 : vector<8x128xi32>
    %c96_i32 = arith.constant 96 : i32
    %56 = vector.broadcast %c96_i32 : i32 to vector<8x128xi32>
    %57 = arith.cmpi slt, %37, %56 : vector<8x128xi32>
    %58 = arith.andi %55, %57 : vector<8x128xi1>
    %cst_12 = arith.constant 0.000000e+00 : f32
    %59 = vector.broadcast %cst_12 : f32 to vector<8x128xf32>
    %60 = arith.select %58, %27, %59 : vector<8x128xi1>, vector<8x128xf32>
    %61 = vector.shape_cast %60 : vector<8x128xf32> to vector<1x8x128xf32>
    %cst_13 = arith.constant dense<0.000000e+00> : vector<8x128xf32>
    %62 = vector.multi_reduction <add>, %61, %cst_13 [0] : vector<1x8x128xf32> to vector<8x128xf32>
    %c0_i32_14 = arith.constant 0 : i32
    %63 = arith.cmpi eq, %arg1, %c0_i32_14 : i32
    %64 = arith.extui %63 : i1 to i32
    %c0_i32_15 = arith.constant 0 : i32
    %65 = arith.cmpi ne, %64, %c0_i32_15 : i32
    scf.if %65 {
      %c0_18 = arith.constant 0 : index
      %c0_19 = arith.constant 0 : index
      %c0_20 = arith.constant 0 : index
      %69 = vector.load %arg5[%c0_18, %c0_19, %c0_20] : memref<1x8x128xf32, #tpu.memory_space<vmem>>, vector<1x8x128xf32>
      %70 = vector.shape_cast %69 : vector<1x8x128xf32> to vector<8x128xf32>
      %71 = vector.shape_cast %62 : vector<8x128xf32> to vector<1x8x128xf32>
      tpu.vector_store %arg5[%c0_18, %c0_19, %c0_20], %71 {strides = array<i32>} : memref<1x8x128xf32, #tpu.memory_space<vmem>>, vector<1x8x128xf32>,
    } else {
    }
    %c0_i32_16 = arith.constant 0 : i32
    %66 = arith.cmpi sgt, %arg1, %c0_i32_16 : i32
    %67 = arith.extui %66 : i1 to i32
    %c0_i32_17 = arith.constant 0 : i32
    %68 = arith.cmpi ne, %67, %c0_i32_17 : i32
    scf.if %68 {
      %c0_18 = arith.constant 0 : index
      %c0_19 = arith.constant 0 : index
      %c0_20 = arith.constant 0 : index
      %69 = vector.load %arg5[%c0_18, %c0_19, %c0_20] : memref<1x8x128xf32, #tpu.memory_space<vmem>>, vector<1x8x128xf32>
      %70 = vector.shape_cast %69 : vector<1x8x128xf32> to vector<8x128xf32>
      %71 = arith.addf %70, %62 : vector<8x128xf32>
      %c0_21 = arith.constant 0 : index
      %c0_22 = arith.constant 0 : index
      %c0_23 = arith.constant 0 : index
      %72 = vector.load %arg5[%c0_21, %c0_22, %c0_23] : memref<1x8x128xf32, #tpu.memory_space<vmem>>, vector<1x8x128xf32>
      %73 = vector.shape_cast %72 : vector<1x8x128xf32> to vector<8x128xf32>
      %74 = vector.shape_cast %71 : vector<8x128xf32> to vector<1x8x128xf32>
      tpu.vector_store %arg5[%c0_21, %c0_22, %c0_23], %74 {strides = array<i32>} : memref<1x8x128xf32, #tpu.memory_space<vmem>>, vector<1x8x128xf32>,
    } else {
    }
    return
  }
  func.func @transform_0(%arg0: i32, %arg1: i32) -> (i32, i32) {
    %c1_i32 = arith.constant 1 : i32
    %0 = arith.muli %arg0, %c1_i32 : i32
    %1 = arith.addi %0, %arg1 : i32
    %c0_i32 = arith.constant 0 : i32
    %c0_i32_0 = arith.constant 0 : i32
    return %1, %c0_i32 : i32, i32
  }
  func.func @transform_1(%arg0: i32, %arg1: i32) -> (i32, i32) {
    %c1_i32 = arith.constant 1 : i32
    %0 = arith.muli %arg0, %c1_i32 : i32
    %1 = arith.addi %0, %arg1 : i32
    %c0_i32 = arith.constant 0 : i32
    %c0_i32_0 = arith.constant 0 : i32
    return %1, %c0_i32 : i32, i32
  }
  func.func @transform_2(%arg0: i32, %arg1: i32) -> (i32, i32) {
    %c1_i32 = arith.constant 1 : i32
    %0 = arith.muli %arg0, %c1_i32 : i32
    %1 = arith.addi %0, %arg1 : i32
    %c0_i32 = arith.constant 0 : i32
    %c0_i32_0 = arith.constant 0 : i32
    return %1, %c0_i32 : i32, i32
  }
  func.func @transform_3(%arg0: i32, %arg1: i32) -> (i32, i32, i32) {
    %c0_i32 = arith.constant 0 : i32
    %c0_i32_0 = arith.constant 0 : i32
    %c0_i32_1 = arith.constant 0 : i32
    return %arg0, %c0_i32, %c0_i32_0 : i32, i32, i32
  }
}

</mosaic_0001>

<bundles_post_ra>
// kernel: tpu_custom_call.1
= control target key start
LH: loop header
LB: loop body
LE: loop exit
PB: predicated region body
PF: predicated region fallthrough
CT: control target
= control target key end

     0   :  { %8 = vsyncpa [#allocation3], 0  ;;  %s275_s0 = inlined_call_operand.hbm [shape: f32[8,128], index: 0, kind: input, shape index: {}]   ;;  %s276_s1 = inlined_call_operand.hbm [shape: f32[8,128], index: 1, kind: input, shape index: {}]   ;;  %s277_s2 = inlined_call_operand.hbm [shape: f32[8,128], index: 2, kind: input, shape index: {}]   ;;  %s278_s3 = inlined_call_operand.hbm [shape: f32[1,8,128], index: 3, kind: output, shape index: {}]  }
   0x1   :  { %9 = vsyncpa [#allocation6], 0 }
   0x2   :  { %10 = vsyncpa [#allocation4], 0  ;;  %s238_s12 = smov [#allocation5]   ;;  %s239_s14 = smov [#allocation2]  }
   0x3   :  { %s33_s13 = sshll.u32 %s238_s12, 4  ;;  %s20_s15 = sshll.u32 %s239_s14, 4  ;;  %s34_s13 = int_to_ptr.vmem [resolvable:$true] %s33_s13  ;;  %s21_s15 = int_to_ptr.vmem [resolvable:$true] %s20_s15 }
   0x4   :  { %s160_s16 = scalar_lea.vmem %s34_s13, 128  ;;  %p165_p1 = scmp.lt.s32.totalorder %s34_s13, %s34_s13 }
   0x5   :  { %p161_p0 = scmp.ne.s32.totalorder %s34_s13, %s160_s16  ;;  %p166_p2 = scmp.lt.s32.totalorder %s160_s16, %s160_s16 }
   0x7   :  { %p167_p3 = por %p166_p2, %p165_p1 }
   0x9   :  { %p168_p4 = pnand %p167_p3, %p161_p0 }
   0xb   :  { %171 = shalt.err (!%p168_p4)
}
   0xc   :  { %36 = dma.hbm_to_vmem [thread:$0]  %s276_s1, 128, %s34_s13, [#allocation6]  }
   0xd   :  { %s180_s19 = scalar_lea.vmem %s21_s15, 128  ;;  %p185_p6 = scmp.lt.s32.totalorder %s21_s15, %s21_s15 }
   0xe   :  { %p181_p5 = scmp.ne.s32.totalorder %s21_s15, %s180_s19  ;;  %p186_p7 = scmp.lt.s32.totalorder %s180_s19, %s180_s19 }
  0x10   :  { %p187_p8 = por %p186_p7, %p185_p6 }
  0x12   :  { %p188_p9 = pnand %p187_p8, %p181_p5 }
  0x14   :  { %191 = shalt.err (!%p188_p9)
}
  0x15   :  { %23 = dma.hbm_to_vmem [thread:$0]  %s275_s0, 128, %s21_s15, [#allocation3]  }
  0x16   :  { %s240_s22 = smov [#allocation7]  }
  0x17   :  { %s46_s23 = sshll.u32 %s240_s22, 4  ;;  %s47_s23 = int_to_ptr.vmem [resolvable:$true] %s46_s23 }
  0x18   :  { %s200_s24 = scalar_lea.vmem %s47_s23, 128  ;;  %p205_p11 = scmp.lt.s32.totalorder %s47_s23, %s47_s23 }
  0x19   :  { %p201_p10 = scmp.ne.s32.totalorder %s47_s23, %s200_s24  ;;  %p206_p12 = scmp.lt.s32.totalorder %s200_s24, %s200_s24 }
  0x1b   :  { %p207_p13 = por %p206_p12, %p205_p11 }
  0x1d   :  { %p208_p0 = pnand %p207_p13, %p201_p10 }
  0x1f   :  { %211 = shalt.err (!%p208_p0)
}
  0x20   :  { %49 = dma.hbm_to_vmem [thread:$0]  %s277_s2, 128, %s47_s23, [#allocation6]  }
  0x21   :  { %232 = dma.done.wait [#allocation3], 128  }
  0x22   :  { %233 = vsyncadd [#allocation3], 4294967168 }
  0x23   :  { %234 = dma.done.wait [#allocation6], 256  }
  0x24   :  { %235 = vsyncadd [#allocation6], 4294967040  ;;  %v62_v0 = vld [vmem:[#allocation2] sm:$0xff]  ;;  %v63_v1 = vld [vmem:[#allocation5] sm:$0xff]  ;;  %s241_s0 = smov 1   ;;  %v90_v12 = vlaneseq  ;;  %s242_s2 = smov [#allocation8]  }
  0x25   :  { %v65_v2 = vmul.f32 %v62_v0, %v62_v0  ;;  %v64_v3 = vmul.f32 %v63_v1, %v62_v0  ;;  %v66_v4 = vmul.f32 %v63_v1, %v63_v1  ;;  %v88_v22 = vld [vmem:[#allocation7] sm:$0xff]  ;;  %s135_s26 = sshll.u32 %s242_s2, 4  ;;  %s136_s26 = int_to_ptr.vmem [resolvable:$true] %s135_s26 }
  0x26   :  { %v93_v13 = vshrl.u32 %v90_v12, 7  ;;  %v91_v14 = vand.u32 127, %v90_v12  ;;  %s212_s27 = scalar_lea.vmem %s136_s26, 128  ;;  %p217_p2 = scmp.lt.s32.totalorder %s136_s26, %s136_s26 }
  0x27   :  { %73 = vrot.lane.b32.xlu0 %v65_v2, %s241_s0  ;;  %68 = vrot.lane.b32.xlu1 %v64_v3, %s241_s0  ;;  %p213_p1 = scmp.ne.s32.totalorder %s136_s26, %s212_s27  ;;  %p218_p3 = scmp.lt.s32.totalorder %s212_s27, %s212_s27 }
  0x28   :  { %v98_v15 = vmul.u32 128, %v93_v13  ;;  %v104_v19 = vand.u32 1, %v91_v14 }
  0x29   :  { %p219_p4 = por %p218_p3, %p217_p2 }
  0x2a   :  { %v99_v18 = vadd.s32 %v98_v15, %v91_v14  ;;  %vm112_vm0 = vcmp.eq.s32.totalorder %v104_v19, 1 }
  0x2b   :  { %78 = vrot.lane.b32.xlu0 %v66_v4, %s241_s0  ;;  %p220_p5 = pnand %p219_p4, %p213_p1 }
  0x2c   :  { %vm113_vm1 = vcmp.lt.s32.totalorder %v99_v18, 96 }
  0x2d   :  { %vm114_vm2 = vmand %vm112_vm0, %vm113_vm1 }
  0x99   :  { %v74_v5 = vpop.permute.xlu0 %73  ;;  %v69_v16 = vpop.permute.xlu1 %68 }
  0x9a   :  { %v76_v6 = vadd.f32 %v74_v5, %v65_v2  ;;  %v71_v17 = vadd.f32 %v69_v16, %v64_v3 }
  0x9c   :  { %v82_v9 = vadd.f32 1e-12, %v76_v6 }
  0x9d   :  { %v79_v7 = vpop.permute.xlu0 %78 }
  0x9e   :  { %v81_v8 = vadd.f32 %v79_v7, %v66_v4 }
  0xa0   :  { %v83_v10 = vadd.f32 1e-12, %v81_v8 }
  0xa2   :  { %v84_v11 = vmul.f32 %v83_v10, %v82_v9 }
  0xa4   :  { %150 = vrsqrt.f32 %v84_v11 }
  0xb1   :  { %v151_v20 = vpop.eup %150 }
  0xb2   :  { %v86_v21 = vmul.f32 %v151_v20, %v71_v17 }
  0xb4   :  { %v87_v23 = vsub.f32 1.0, %v86_v21 }
  0xb6   :  { %v89_v24 = vmul.f32 %v88_v22, %v87_v23 }
  0xb8   :  { %v115_v25 = vsel %vm114_vm2, %v89_v24, 0.0 }
  0xb9   :  { %121 = vst [vmem:[#allocation8] sm:$0xff] %v115_v25 }
  0xba   :  { %223 = shalt.err (!%p220_p5)
}
  0xbb   :  { %138 = dma.vmem_to_hbm [thread:$0]  %s136_s26, 128, %s278_s3, [#allocation4]  }
  0xbc   :  { %236 = dma.done.wait [#allocation4], 128  }
  0xbd   :  { %237 = vsyncadd [#allocation4], 4294967168 }
  0xbe   :  { %142 = vsyncpa [#allocation3], 1 }
  0xbf   :  { %143 = vsyncpa [#allocation6], 1 }
  0xc0   :  { %144 = vsyncpa [#allocation4], 1 }

</bundles_post_ra>
